<compile_context>
chip_gen: v6e
topology: v6e:2x2x1
jax: 0.10.0
libtpu: 0.0.40
codegen_flags: <defaults>
</compile_context>

<pallas_src>
import functools

import jax
import jax.numpy as jnp
from jax import lax
from jax.experimental import pallas as pl
from jax.experimental.pallas import tpu as pltpu

EPS = 1e-5          # BatchNorm1d eps
_LANE = 128
_SUBLANE = 8
_VMEM_HEADROOM = 8 << 20      # compiler internal scratch / semaphores / slack
_FAST_PATH_FRACTION = 0.7     # of (capacity - headroom) -> ~40MiB v7x, ~85MiB v5e/v6e


def _round_up(n, m):
    return ((n + m - 1) // m) * m


def _pad2d(a, rows, cols):
    r, c = a.shape
    return jnp.pad(a, ((0, rows - r), (0, cols - c)))


def _pad3d(a, rows, cols):
    _, r, c = a.shape
    return jnp.pad(a, ((0, 0), (0, rows - r), (0, cols - c)))


def _vmem_capacity_bytes():
    """Generation-aware VMEM capacity (v5e/v6e: 128MiB, v7x: 64MiB)."""
    try:
        return int(pltpu.get_tpu_info().vmem_capacity_bytes)
    except Exception:
        return 64 << 20   # conservative (v7x-sized) fallback


def _bn_scale_shift(z, gamma, beta, mask, inv_n):
    """Training-mode BN folded into a per-feature scale/shift.

    Returns (scale, shift) with gamma*BN(z)+beta == scale*z + shift, so the
    full-tile epilogue is a single multiply + add.  `mask` is a (Bp,1) 0/1 f32
    column selecting the true batch rows (None when batch == padded batch).
    """
    if mask is not None:
        zm = z * mask
        s1 = jnp.sum(zm, axis=0, keepdims=True)
        s2 = jnp.sum(zm * zm, axis=0, keepdims=True)
    else:
        s1 = jnp.sum(z, axis=0, keepdims=True)
        s2 = jnp.sum(z * z, axis=0, keepdims=True)
    mean = s1 * inv_n
    var = s2 * inv_n - mean * mean              # biased batch variance
    scale = gamma * lax.rsqrt(var + EPS)        # (1, Wp), EUP rsqrt
    shift = beta - scale * mean                 # (1, Wp)
    return scale, shift


# --------------------------------------------------------------------------- #
# Fast path: everything resident, no grid, depth loop inside the kernel.
# --------------------------------------------------------------------------- #
def _mlp_l_fused_kernel(x_ref, w_in_ref, b_in_ref, w_res_ref, bgb_ref,
                        w_out_ref, b_out_ref, o_ref,
                        *, depth, n_batch, n_batch_padded, unroll):
    # ---- input layer ---------------------------------------------------------
    h0 = (jnp.dot(x_ref[...], w_in_ref[...],
                  preferred_element_type=jnp.float32) + b_in_ref[...])

    inv_n = jnp.float32(1.0 / n_batch)
    if n_batch != n_batch_padded:
        row = lax.broadcasted_iota(jnp.int32, (n_batch_padded, 1), 0)
        mask = (row < n_batch).astype(jnp.float32)   # hoisted out of the loop
    else:
        mask = None

    # ---- depth x ResBlock: h + BN(ReLU(h @ W_i + b_i)) -----------------------
    def res_block(i, h):
        w = w_res_ref[i]                   # (Wp, Wp) bf16
        bgb = bgb_ref[i]                   # (3, Wp) f32: [bias; gamma; beta]
        z = (jnp.dot(h.astype(jnp.bfloat16), w,
                     preferred_element_type=jnp.float32) + bgb[0:1, :])
        z = jnp.maximum(z, 0.0)
        scale, shift = _bn_scale_shift(z, bgb[1:2, :], bgb[2:3, :], mask, inv_n)
        return h + scale * z + shift

    h = lax.fori_loop(0, depth, res_block, h0, unroll=unroll)

    # ---- output layer --------------------------------------------------------
    o_ref[...] = (jnp.dot(h.astype(jnp.bfloat16), w_out_ref[...],
                          preferred_element_type=jnp.float32)
                  + b_out_ref[...]).astype(o_ref.dtype)


# --------------------------------------------------------------------------- #
# Streamed path: grid=(depth,), per-layer weights stream from HBM.
# --------------------------------------------------------------------------- #
def _mlp_l_streamed_kernel(x_ref, w_in_ref, b_in_ref, w_res_ref, bgb_ref,
                           w_out_ref, b_out_ref, o_ref, h_ref, mask_ref,
                           *, n_batch, n_batch_padded):
    d = pl.program_id(0)
    masked = n_batch != n_batch_padded

    # ---- first grid step: input layer + hoisted pad-row mask ------------------
    @pl.when(d == 0)
    def _():
        h_ref[...] = (jnp.dot(x_ref[...], w_in_ref[...],
                              preferred_element_type=jnp.float32) + b_in_ref[...])
        if masked:
            row = lax.broadcasted_iota(jnp.int32, (n_batch_padded, 1), 0)
            mask_ref[...] = (row < n_batch).astype(jnp.float32)

    # ---- ResBlock d: h + BN(ReLU(h @ W_d + b_d)) -------------------------------
    h = h_ref[...]                                              # (Bp, Wp) f32
    z = (jnp.dot(h.astype(jnp.bfloat16), w_res_ref[...],        # (Wp, Wp) bf16
                 preferred_element_type=jnp.float32) + bgb_ref[0:1, :])
    z = jnp.maximum(z, 0.0)
    scale, shift = _bn_scale_shift(z, bgb_ref[1:2, :], bgb_ref[2:3, :],
                                   mask_ref[...] if masked else None,
                                   jnp.float32(1.0 / n_batch))
    h_new = h + scale * z + shift
    h_ref[...] = h_new

    # ---- last grid step: output layer ------------------------------------------
    @pl.when(d == pl.num_programs(0) - 1)
    def _():
        o_ref[...] = (jnp.dot(h_new.astype(jnp.bfloat16), w_out_ref[...],
                              preferred_element_type=jnp.float32)
                      + b_out_ref[...]).astype(o_ref.dtype)


# --------------------------------------------------------------------------- #
# Host wrapper
# --------------------------------------------------------------------------- #
def mlp_l_forward(x, params, *, force_streamed=False):
    depth = params["w_res"].shape[0]
    B, D_in = x.shape
    W = params["w_in"].shape[0]
    O = params["w_out"].shape[0]

    Bp = _round_up(B, _SUBLANE)
    Dp = _round_up(D_in, _LANE)
    Wp = _round_up(W, _LANE)
    Op = _round_up(O, _LANE)

    # Host-side layout plumbing: zero-pad to lane/sublane multiples, transpose
    # every weight to (in, out), cast MXU operands (x and weights) to bf16.
    xp      = _pad2d(x, Bp, Dp).astype(jnp.bfloat16)
    w_in_t  = _pad2d(params["w_in"].T, Dp, Wp).astype(jnp.bfloat16)
    b_in_p  = _pad2d(params["b_in"].astype(jnp.float32), 1, Wp)
    w_res_t = _pad3d(jnp.transpose(params["w_res"], (0, 2, 1)),
                     Wp, Wp).astype(jnp.bfloat16)
    # Packed per-layer vectors: one (depth, 3, Wp) f32 block -> one DMA per step.
    bgb_p = jnp.concatenate([
        _pad3d(params["b_res"].astype(jnp.float32), 1, Wp),
        _pad3d(params["gamma"].astype(jnp.float32), 1, Wp),
        _pad3d(params["beta"].astype(jnp.float32), 1, Wp),
    ], axis=1)
    w_out_t = _pad2d(params["w_out"].T, Wp, Op).astype(jnp.bfloat16)
    b_out_p = _pad2d(params["b_out"].astype(jnp.float32), 1, Op)

    vmem_cap = _vmem_capacity_bytes()
    budget = vmem_cap - _VMEM_HEADROOM

    # ---- fast-path sizing -------------------------------------------------------
    weight_bytes = (Dp * Wp + depth * Wp * Wp + Wp * Op) * 2           # bf16
    vec_bytes = (Wp + depth * 3 * Wp + Op) * 4                         # f32
    act_bytes = Bp * Dp * 2 + Bp * Op * 4 + 6 * Bp * Wp * 4            # x, out, h/z temps
    fused_bytes = weight_bytes + vec_bytes + act_bytes

    use_fast = (not force_streamed) and fused_bytes <= _FAST_PATH_FRACTION * budget

    operands = (xp, w_in_t, b_in_p, w_res_t, bgb_p, w_out_t, b_out_p)
    out_shape = jax.ShapeDtypeStruct((Bp, Op), jnp.float32)

    if use_fast:
        kernel = functools.partial(
            _mlp_l_fused_kernel, depth=depth, n_batch=B, n_batch_padded=Bp,
            unroll=depth <= 8)
        vmem_req = int(max(min(budget, fused_bytes + (4 << 20)), 8 << 20))
        vmem_spec = pl.BlockSpec(memory_space=pltpu.MemorySpace.VMEM)
        out_padded = pl.pallas_call(
            kernel,
            out_shape=out_shape,
            in_specs=[vmem_spec] * len(operands),
            out_specs=vmem_spec,
            compiler_params=pltpu.CompilerParams(vmem_limit_bytes=vmem_req),
        )(*operands)
    else:
        assert depth >= 1, "streamed MLP_l path requires depth >= 1"
        # Residents: single-buffered constants, f32 h + mask scratch, output.
        resident = (Bp * Dp * 2 + Dp * Wp * 2 + Wp * 4          # x, w_in, b_in
                    + Wp * Op * 2 + Op * 4                      # w_out, b_out
                    + 2 * Bp * Op * 4                           # out (conservative)
                    + Bp * Wp * 4 + _SUBLANE * _LANE * 4)       # h scratch, mask
        per_block = Wp * Wp * 2 + 3 * Wp * 4                    # streamed w_res + bgb
        temps = 4 * Bp * Wp * 4 + (2 << 20)
        # Deeper buffering on the streamed weight when VMEM allows (hides DMA
        # jitter in the HBM-bound small-batch regime, esp. on 128MiB v5e/v6e).
        wres_bufs = 3 if resident + 3 * per_block + temps <= budget else 2
        vmem_req = resident + wres_bufs * per_block + temps
        if vmem_req > budget:
            # TODO(synk): feature-tile w_res (grid=(depth, Wp//TN), ping-pong h
            # scratch) instead of failing; required for very large W on v7x.
            raise ValueError(
                f"MLP_l streamed path needs ~{vmem_req >> 20} MiB VMEM but only "
                f"~{budget >> 20} MiB is available on this TPU generation; "
                f"reduce width/batch or add feature tiling.")

        kernel = functools.partial(
            _mlp_l_streamed_kernel, n_batch=B, n_batch_padded=Bp)

        def _const(shape):
            # Constant-index operands never change across the depth grid ->
            # single-buffer them to free VMEM for deeper w_res buffering.
            return pl.BlockSpec(shape, lambda d: (0,) * len(shape),
                                pipeline_mode=pl.Buffered(1))

        grid_spec = pltpu.PrefetchScalarGridSpec(
            num_scalar_prefetch=0,
            grid=(depth,),
            in_specs=[
                _const((Bp, Dp)),                                     # x
                _const((Dp, Wp)),                                     # w_in
                _const((1, Wp)),                                      # b_in
                pl.BlockSpec((None, Wp, Wp), lambda d: (d, 0, 0),
                             pipeline_mode=pl.Buffered(wres_bufs)),   # w_res[d]
                pl.BlockSpec((None, 3, Wp), lambda d: (d, 0, 0),
                             pipeline_mode=pl.Buffered(wres_bufs)),   # [b;g;beta][d]
                _const((Wp, Op)),                                     # w_out
                _const((1, Op)),                                      # b_out
            ],
            out_specs=pl.BlockSpec((Bp, Op), lambda d: (0, 0)),
            scratch_shapes=[pltpu.VMEM((Bp, Wp), jnp.float32),        # residual carry
                            pltpu.VMEM((Bp, 1), jnp.float32)],        # pad-row mask
        )
        out_padded = pl.pallas_call(
            kernel,
            out_shape=out_shape,
            grid_spec=grid_spec,
            compiler_params=pltpu.CompilerParams(
                dimension_semantics=("arbitrary",),   # depth axis carries state
                vmem_limit_bytes=int(max(vmem_req, 8 << 20))),
        )(*operands)

    return out_padded[:B, :O]


# --------------------------------------------------------------------------- #
# Parameter init (matches the PyTorch module's shapes) and pure-JAX reference.
# --------------------------------------------------------------------------- #
def init_params(key, input_dim, width, output_dim, depth):
    ks = jax.random.split(key, 6)

    def uniform(k, fan_in, shape):
        bound = 1.0 / float(fan_in) ** 0.5
        return jax.random.uniform(k, shape, jnp.float32, -bound, bound)

    return {
        "w_in":  uniform(ks[0], input_dim, (width, input_dim)),
        "b_in":  uniform(ks[1], input_dim, (1, width)),
        "w_res": uniform(ks[2], width, (depth, width, width)),
        "b_res": uniform(ks[3], width, (depth, 1, width)),
        "gamma": jnp.ones((depth, 1, width), jnp.float32),    # BN weight init = 1
        "beta":  jnp.zeros((depth, 1, width), jnp.float32),   # BN bias init = 0
        "w_out": uniform(ks[4], width, (output_dim, width)),
        "b_out": uniform(ks[5], width, (1, output_dim)),
    }


def _reference_forward(x, params):
    """Pure-JAX reference of MLP_l.forward mirroring the kernel numerics
    (bf16 MXU inputs, f32 accumulation / BN / residual), training-mode BN."""
    bf, f32 = jnp.bfloat16, jnp.float32
    h = (jnp.dot(x.astype(bf), params["w_in"].T.astype(bf),
                 preferred_element_type=f32) + params["b_in"])
    for i in range(params["w_res"].shape[0]):
        z = (jnp.dot(h.astype(bf), params["w_res"][i].T.astype(bf),
                     preferred_element_type=f32) + params["b_res"][i])
        z = jnp.maximum(z, 0.0)
        mean = jnp.mean(z, axis=0, keepdims=True)
        c = z - mean
        var = jnp.mean(c * c, axis=0, keepdims=True)
        h = h + params["gamma"][i] * (c * lax.rsqrt(var + EPS)) + params["beta"][i]
    return (jnp.dot(h.astype(bf), params["w_out"].T.astype(bf),
                    preferred_element_type=f32) + params["b_out"])


if __name__ == "__main__":
    key = jax.random.PRNGKey(0)
    k_x, k_p, k_x2, k_p2 = jax.random.split(key, 4)

    # Demo 1: batch is a sublane multiple (no pad-row masking), fused fast path.
    batch, input_dim, width, output_dim, depth = 8, 16, 32, 8, 3
    x = jax.random.normal(k_x, (batch, input_dim), jnp.float32)
    params = init_params(k_p, input_dim, width, output_dim, depth)
    out = jax.block_until_ready(mlp_l_forward(x, params))
    ref = _reference_forward(x, params)
    assert out.shape == (batch, output_dim)
    assert jnp.allclose(out, ref, atol=2e-3, rtol=2e-3), "mismatch vs reference (demo 1)"

    # Demo 2: ragged batch exercising the masked training-mode BN statistics.
    batch2, input_dim2, width2, output_dim2, depth2 = 13, 20, 48, 5, 2
    x2 = jax.random.normal(k_x2, (batch2, input_dim2), jnp.float32)
    params2 = init_params(k_p2, input_dim2, width2, output_dim2, depth2)
    out2 = jax.block_until_ready(mlp_l_forward(x2, params2))
    ref2 = _reference_forward(x2, params2)
    assert out2.shape == (batch2, output_dim2)
    assert jnp.allclose(out2, ref2, atol=2e-3, rtol=2e-3), "mismatch vs reference (demo 2)"

    print("KERNEL_OK")
</pallas_src>

<mosaic_0001>
module attributes {stable_mosaic.version = 11 : i64} {
  func.func @_mlp_l_fused_kernel(%arg0: memref<8x128xbf16, #tpu.memory_space<vmem>>, %arg1: memref<128x128xbf16, #tpu.memory_space<vmem>>, %arg2: memref<1x128xf32, #tpu.memory_space<vmem>>, %arg3: memref<3x128x128xbf16, #tpu.memory_space<vmem>>, %arg4: memref<3x3x128xf32, #tpu.memory_space<vmem>>, %arg5: memref<128x128xbf16, #tpu.memory_space<vmem>>, %arg6: memref<1x128xf32, #tpu.memory_space<vmem>>, %arg7: memref<8x128xf32, #tpu.memory_space<vmem>>) attributes {dimension_semantics = [], scalar_prefetch = 0 : i64, scratch_operands = 0 : i64, tpu.core_type = #tpu.core_type<tc>} {
    %c0 = arith.constant 0 : index
    %c0_0 = arith.constant 0 : index
    %0 = vector.load %arg0[%c0, %c0_0] : memref<8x128xbf16, #tpu.memory_space<vmem>>, vector<8x128xbf16>
    %c0_1 = arith.constant 0 : index
    %c0_2 = arith.constant 0 : index
    %1 = vector.load %arg1[%c0_1, %c0_2] : memref<128x128xbf16, #tpu.memory_space<vmem>>, vector<128x128xbf16>
    %cst = arith.constant dense<0.000000e+00> : vector<8x128xf32>
    %2 = tpu.matmul %0, %1, %cst {dimension_numbers = #tpu.dot_dimension_numbers<[1], [0], [0], [1], [0, 0, 1, 1], [], []>} : vector<8x128xbf16>, vector<128x128xbf16>, vector<8x128xf32> -> vector<8x128xf32>
    %c0_3 = arith.constant 0 : index
    %c0_4 = arith.constant 0 : index
    %3 = vector.load %arg2[%c0_3, %c0_4] : memref<1x128xf32, #tpu.memory_space<vmem>>, vector<1x128xf32>
    %4 = vector.broadcast %3 : vector<1x128xf32> to vector<8x128xf32>
    %5 = arith.addf %2, %4 : vector<8x128xf32>
    %cst_5 = arith.constant 1.250000e-01 : f32
    %c0_i32 = arith.constant 0 : i32
    %6 = arith.index_cast %c0_i32 : i32 to index
    %c0_6 = arith.constant 0 : index
    %c0_7 = arith.constant 0 : index
    %7 = vector.load %arg3[%6, %c0_6, %c0_7] : memref<3x128x128xbf16, #tpu.memory_space<vmem>>, vector<1x128x128xbf16>
    %8 = vector.shape_cast %7 : vector<1x128x128xbf16> to vector<128x128xbf16>
    %9 = arith.index_cast %c0_i32 : i32 to index
    %c0_8 = arith.constant 0 : index
    %c0_9 = arith.constant 0 : index
    %10 = vector.load %arg4[%9, %c0_8, %c0_9] : memref<3x3x128xf32, #tpu.memory_space<vmem>>, vector<1x3x128xf32>
    %11 = vector.shape_cast %10 : vector<1x3x128xf32> to vector<3x128xf32>
    %12 = arith.truncf %5 : vector<8x128xf32> to vector<8x128xbf16>
    %cst_10 = arith.constant dense<0.000000e+00> : vector<8x128xf32>
    %13 = tpu.matmul %12, %8, %cst_10 {dimension_numbers = #tpu.dot_dimension_numbers<[1], [0], [0], [1], [0, 0, 1, 1], [], []>} : vector<8x128xbf16>, vector<128x128xbf16>, vector<8x128xf32> -> vector<8x128xf32>
    %14 = vector.extract_strided_slice %11 {offsets = [0, 0], sizes = [1, 128], strides = [1, 1]} : vector<3x128xf32> to vector<1x128xf32>
    %15 = vector.broadcast %14 : vector<1x128xf32> to vector<8x128xf32>
    %16 = arith.addf %13, %15 : vector<8x128xf32>
    %cst_11 = arith.constant 0.000000e+00 : f32
    %17 = vector.broadcast %cst_11 : f32 to vector<8x128xf32>
    %18 = arith.maximumf %16, %17 : vector<8x128xf32>
    %19 = vector.extract_strided_slice %11 {offsets = [1, 0], sizes = [1, 128], strides = [1, 1]} : vector<3x128xf32> to vector<1x128xf32>
    %20 = vector.extract_strided_slice %11 {offsets = [2, 0], sizes = [1, 128], strides = [1, 1]} : vector<3x128xf32> to vector<1x128xf32>
    %cst_12 = arith.constant dense<0.000000e+00> : vector<128xf32>
    %21 = vector.multi_reduction <add>, %18, %cst_12 [0] : vector<8x128xf32> to vector<128xf32>
    %22 = vector.shape_cast %21 : vector<128xf32> to vector<1x128xf32>
    %23 = arith.mulf %18, %18 : vector<8x128xf32>
    %cst_13 = arith.constant dense<0.000000e+00> : vector<128xf32>
    %24 = vector.multi_reduction <add>, %23, %cst_13 [0] : vector<8x128xf32> to vector<128xf32>
    %25 = vector.shape_cast %24 : vector<128xf32> to vector<1x128xf32>
    %26 = vector.broadcast %cst_5 : f32 to vector<1x128xf32>
    %27 = arith.mulf %22, %26 : vector<1x128xf32>
    %28 = vector.broadcast %cst_5 : f32 to vector<1x128xf32>
    %29 = arith.mulf %25, %28 : vector<1x128xf32>
    %30 = arith.mulf %27, %27 : vector<1x128xf32>
    %31 = arith.subf %29, %30 : vector<1x128xf32>
    %cst_14 = arith.constant 9.99999974E-6 : f32
    %32 = vector.broadcast %cst_14 : f32 to vector<1x128xf32>
    %33 = arith.addf %31, %32 : vector<1x128xf32>
    %34 = math.rsqrt %33 : vector<1x128xf32>
    %35 = arith.mulf %19, %34 : vector<1x128xf32>
    %36 = arith.mulf %35, %27 : vector<1x128xf32>
    %37 = arith.subf %20, %36 : vector<1x128xf32>
    %38 = vector.broadcast %35 : vector<1x128xf32> to vector<8x128xf32>
    %39 = arith.mulf %38, %18 : vector<8x128xf32>
    %40 = arith.addf %5, %39 : vector<8x128xf32>
    %41 = vector.broadcast %37 : vector<1x128xf32> to vector<8x128xf32>
    %42 = arith.addf %40, %41 : vector<8x128xf32>
    %c1_i32 = arith.constant 1 : i32
    %43 = arith.index_cast %c1_i32 : i32 to index
    %c0_15 = arith.constant 0 : index
    %c0_16 = arith.constant 0 : index
    %44 = vector.load %arg3[%43, %c0_15, %c0_16] : memref<3x128x128xbf16, #tpu.memory_space<vmem>>, vector<1x128x128xbf16>
    %45 = vector.shape_cast %44 : vector<1x128x128xbf16> to vector<128x128xbf16>
    %46 = arith.index_cast %c1_i32 : i32 to index
    %c0_17 = arith.constant 0 : index
    %c0_18 = arith.constant 0 : index
    %47 = vector.load %arg4[%46, %c0_17, %c0_18] : memref<3x3x128xf32, #tpu.memory_space<vmem>>, vector<1x3x128xf32>
    %48 = vector.shape_cast %47 : vector<1x3x128xf32> to vector<3x128xf32>
    %49 = arith.truncf %42 : vector<8x128xf32> to vector<8x128xbf16>
    %cst_19 = arith.constant dense<0.000000e+00> : vector<8x128xf32>
    %50 = tpu.matmul %49, %45, %cst_19 {dimension_numbers = #tpu.dot_dimension_numbers<[1], [0], [0], [1], [0, 0, 1, 1], [], []>} : vector<8x128xbf16>, vector<128x128xbf16>, vector<8x128xf32> -> vector<8x128xf32>
    %51 = vector.extract_strided_slice %48 {offsets = [0, 0], sizes = [1, 128], strides = [1, 1]} : vector<3x128xf32> to vector<1x128xf32>
    %52 = vector.broadcast %51 : vector<1x128xf32> to vector<8x128xf32>
    %53 = arith.addf %50, %52 : vector<8x128xf32>
    %cst_20 = arith.constant 0.000000e+00 : f32
    %54 = vector.broadcast %cst_20 : f32 to vector<8x128xf32>
    %55 = arith.maximumf %53, %54 : vector<8x128xf32>
    %56 = vector.extract_strided_slice %48 {offsets = [1, 0], sizes = [1, 128], strides = [1, 1]} : vector<3x128xf32> to vector<1x128xf32>
    %57 = vector.extract_strided_slice %48 {offsets = [2, 0], sizes = [1, 128], strides = [1, 1]} : vector<3x128xf32> to vector<1x128xf32>
    %cst_21 = arith.constant dense<0.000000e+00> : vector<128xf32>
    %58 = vector.multi_reduction <add>, %55, %cst_21 [0] : vector<8x128xf32> to vector<128xf32>
    %59 = vector.shape_cast %58 : vector<128xf32> to vector<1x128xf32>
    %60 = arith.mulf %55, %55 : vector<8x128xf32>
    %cst_22 = arith.constant dense<0.000000e+00> : vector<128xf32>
    %61 = vector.multi_reduction <add>, %60, %cst_22 [0] : vector<8x128xf32> to vector<128xf32>
    %62 = vector.shape_cast %61 : vector<128xf32> to vector<1x128xf32>
    %63 = vector.broadcast %cst_5 : f32 to vector<1x128xf32>
    %64 = arith.mulf %59, %63 : vector<1x128xf32>
    %65 = vector.broadcast %cst_5 : f32 to vector<1x128xf32>
    %66 = arith.mulf %62, %65 : vector<1x128xf32>
    %67 = arith.mulf %64, %64 : vector<1x128xf32>
    %68 = arith.subf %66, %67 : vector<1x128xf32>
    %cst_23 = arith.constant 9.99999974E-6 : f32
    %69 = vector.broadcast %cst_23 : f32 to vector<1x128xf32>
    %70 = arith.addf %68, %69 : vector<1x128xf32>
    %71 = math.rsqrt %70 : vector<1x128xf32>
    %72 = arith.mulf %56, %71 : vector<1x128xf32>
    %73 = arith.mulf %72, %64 : vector<1x128xf32>
    %74 = arith.subf %57, %73 : vector<1x128xf32>
    %75 = vector.broadcast %72 : vector<1x128xf32> to vector<8x128xf32>
    %76 = arith.mulf %75, %55 : vector<8x128xf32>
    %77 = arith.addf %42, %76 : vector<8x128xf32>
    %78 = vector.broadcast %74 : vector<1x128xf32> to vector<8x128xf32>
    %79 = arith.addf %77, %78 : vector<8x128xf32>
    %c2_i32 = arith.constant 2 : i32
    %80 = arith.index_cast %c2_i32 : i32 to index
    %c0_24 = arith.constant 0 : index
    %c0_25 = arith.constant 0 : index
    %81 = vector.load %arg3[%80, %c0_24, %c0_25] : memref<3x128x128xbf16, #tpu.memory_space<vmem>>, vector<1x128x128xbf16>
    %82 = vector.shape_cast %81 : vector<1x128x128xbf16> to vector<128x128xbf16>
    %83 = arith.index_cast %c2_i32 : i32 to index
    %c0_26 = arith.constant 0 : index
    %c0_27 = arith.constant 0 : index
    %84 = vector.load %arg4[%83, %c0_26, %c0_27] : memref<3x3x128xf32, #tpu.memory_space<vmem>>, vector<1x3x128xf32>
    %85 = vector.shape_cast %84 : vector<1x3x128xf32> to vector<3x128xf32>
    %86 = arith.truncf %79 : vector<8x128xf32> to vector<8x128xbf16>
    %cst_28 = arith.constant dense<0.000000e+00> : vector<8x128xf32>
    %87 = tpu.matmul %86, %82, %cst_28 {dimension_numbers = #tpu.dot_dimension_numbers<[1], [0], [0], [1], [0, 0, 1, 1], [], []>} : vector<8x128xbf16>, vector<128x128xbf16>, vector<8x128xf32> -> vector<8x128xf32>
    %88 = vector.extract_strided_slice %85 {offsets = [0, 0], sizes = [1, 128], strides = [1, 1]} : vector<3x128xf32> to vector<1x128xf32>
    %89 = vector.broadcast %88 : vector<1x128xf32> to vector<8x128xf32>
    %90 = arith.addf %87, %89 : vector<8x128xf32>
    %cst_29 = arith.constant 0.000000e+00 : f32
    %91 = vector.broadcast %cst_29 : f32 to vector<8x128xf32>
    %92 = arith.maximumf %90, %91 : vector<8x128xf32>
    %93 = vector.extract_strided_slice %85 {offsets = [1, 0], sizes = [1, 128], strides = [1, 1]} : vector<3x128xf32> to vector<1x128xf32>
    %94 = vector.extract_strided_slice %85 {offsets = [2, 0], sizes = [1, 128], strides = [1, 1]} : vector<3x128xf32> to vector<1x128xf32>
    %cst_30 = arith.constant dense<0.000000e+00> : vector<128xf32>
    %95 = vector.multi_reduction <add>, %92, %cst_30 [0] : vector<8x128xf32> to vector<128xf32>
    %96 = vector.shape_cast %95 : vector<128xf32> to vector<1x128xf32>
    %97 = arith.mulf %92, %92 : vector<8x128xf32>
    %cst_31 = arith.constant dense<0.000000e+00> : vector<128xf32>
    %98 = vector.multi_reduction <add>, %97, %cst_31 [0] : vector<8x128xf32> to vector<128xf32>
    %99 = vector.shape_cast %98 : vector<128xf32> to vector<1x128xf32>
    %100 = vector.broadcast %cst_5 : f32 to vector<1x128xf32>
    %101 = arith.mulf %96, %100 : vector<1x128xf32>
    %102 = vector.broadcast %cst_5 : f32 to vector<1x128xf32>
    %103 = arith.mulf %99, %102 : vector<1x128xf32>
    %104 = arith.mulf %101, %101 : vector<1x128xf32>
    %105 = arith.subf %103, %104 : vector<1x128xf32>
    %cst_32 = arith.constant 9.99999974E-6 : f32
    %106 = vector.broadcast %cst_32 : f32 to vector<1x128xf32>
    %107 = arith.addf %105, %106 : vector<1x128xf32>
    %108 = math.rsqrt %107 : vector<1x128xf32>
    %109 = arith.mulf %93, %108 : vector<1x128xf32>
    %110 = arith.mulf %109, %101 : vector<1x128xf32>
    %111 = arith.subf %94, %110 : vector<1x128xf32>
    %112 = vector.broadcast %109 : vector<1x128xf32> to vector<8x128xf32>
    %113 = arith.mulf %112, %92 : vector<8x128xf32>
    %114 = arith.addf %79, %113 : vector<8x128xf32>
    %115 = vector.broadcast %111 : vector<1x128xf32> to vector<8x128xf32>
    %116 = arith.addf %114, %115 : vector<8x128xf32>
    %c3_i32 = arith.constant 3 : i32
    %117 = arith.truncf %116 : vector<8x128xf32> to vector<8x128xbf16>
    %c0_33 = arith.constant 0 : index
    %c0_34 = arith.constant 0 : index
    %118 = vector.load %arg5[%c0_33, %c0_34] : memref<128x128xbf16, #tpu.memory_space<vmem>>, vector<128x128xbf16>
    %cst_35 = arith.constant dense<0.000000e+00> : vector<8x128xf32>
    %119 = tpu.matmul %117, %118, %cst_35 {dimension_numbers = #tpu.dot_dimension_numbers<[1], [0], [0], [1], [0, 0, 1, 1], [], []>} : vector<8x128xbf16>, vector<128x128xbf16>, vector<8x128xf32> -> vector<8x128xf32>
    %c0_36 = arith.constant 0 : index
    %c0_37 = arith.constant 0 : index
    %120 = vector.load %arg6[%c0_36, %c0_37] : memref<1x128xf32, #tpu.memory_space<vmem>>, vector<1x128xf32>
    %121 = vector.broadcast %120 : vector<1x128xf32> to vector<8x128xf32>
    %122 = arith.addf %119, %121 : vector<8x128xf32>
    %c0_38 = arith.constant 0 : index
    %c0_39 = arith.constant 0 : index
    %123 = vector.load %arg7[%c0_38, %c0_39] : memref<8x128xf32, #tpu.memory_space<vmem>>, vector<8x128xf32>
    tpu.vector_store %arg7[%c0_38, %c0_39], %122 {strides = array<i32>} : memref<8x128xf32, #tpu.memory_space<vmem>>, vector<8x128xf32>,
    return
  }
}

</mosaic_0001>

<bundles_post_ra>
// kernel: tpu_custom_call.1
= control target key start
LH: loop header
LB: loop body
LE: loop exit
PB: predicated region body
PF: predicated region fallthrough
CT: control target
= control target key end

     0   :  { %12 = vsyncpa [#allocation3], 0  ;;  %s1308_s0 = inlined_call_operand.hbm [shape: bf16[8,128], index: 0, kind: input, shape index: {}]   ;;  %s1309_s1 = inlined_call_operand.hbm [shape: bf16[128,128], index: 1, kind: input, shape index: {}]   ;;  %s1310_s2 = inlined_call_operand.vmem [shape: f32[1,128], index: 2, kind: input, shape index: {}]   ;;  %s1311_s3 = inlined_call_operand.hbm [shape: bf16[3,128,128], index: 3, kind: input, shape index: {}]   ;;  %s1312_s4 = inlined_call_operand.hbm [shape: f32[3,3,128], index: 4, kind: input, shape index: {}]   ;;  %s1313_s5 = inlined_call_operand.hbm [shape: bf16[128,128], index: 5, kind: input, shape index: {}]   ;;  %s1314_s6 = inlined_call_operand.vmem [shape: f32[1,128], index: 6, kind: input, shape index: {}]   ;;  %s1315_s7 = inlined_call_operand.hbm [shape: f32[8,128], index: 7, kind: output, shape index: {}]  }
   0x1   :  { %13 = vsyncpa [#allocation6], 0 }
   0x2   :  { %14 = vsyncpa [#allocation9], 0 }
   0x3   :  { %15 = vsyncpa [#allocation4], 0  ;;  %s1152_s24 = smov [#allocation5]  }
   0x4   :  { %s31_s25 = sshll.u32 %s1152_s24, 4  ;;  %s32_s25 = int_to_ptr.vmem [resolvable:$true] %s31_s25 }
   0x5   :  { %s1032_s26 = scalar_lea.vmem %s32_s25, 1024  ;;  %p1037_p1 = scmp.lt.s32.totalorder %s32_s25, %s32_s25 }
   0x6   :  { %p1033_p0 = scmp.ne.s32.totalorder %s32_s25, %s1032_s26  ;;  %p1038_p2 = scmp.lt.s32.totalorder %s1032_s26, %s1032_s26 }
   0x8   :  { %p1039_p3 = por %p1038_p2, %p1037_p1 }
   0xa   :  { %p1040_p4 = pnand %p1039_p3, %p1033_p0 }
   0xc   :  { %1043 = shalt.err (!%p1040_p4)
}
   0xd   :  { %s1153_s27 = smov 64   ;;  %s1154_s28 = smov 4  }
   0xe   :  { %37 = dma.hbm_to_vmem [thread:$0]  %s1309_s1, 1024, %s32_s25, [#allocation6], %s1153_s27, %s1153_s27, %s1154_s28  }
   0xf   :  { %s1155_s8 = smov [#allocation8]   ;;  %s1156_s10 = smov [#allocation2]  }
  0x10   :  { %s57_s9 = sshll.u32 %s1155_s8, 4  ;;  %s22_s11 = sshll.u32 %s1156_s10, 4  ;;  %s58_s9 = int_to_ptr.vmem [resolvable:$true] %s57_s9  ;;  %s23_s11 = int_to_ptr.vmem [resolvable:$true] %s22_s11 }
  0x11   :  { %s1052_s12 = scalar_lea.vmem %s58_s9, 192  ;;  %p1057_p6 = scmp.lt.s32.totalorder %s58_s9, %s58_s9 }
  0x12   :  { %p1053_p5 = scmp.ne.s32.totalorder %s58_s9, %s1052_s12  ;;  %p1058_p7 = scmp.lt.s32.totalorder %s1052_s12, %s1052_s12 }
  0x14   :  { %p1059_p8 = por %p1058_p7, %p1057_p6 }
  0x16   :  { %p1060_p9 = pnand %p1059_p8, %p1053_p5 }
  0x18   :  { %1063 = shalt.err (!%p1060_p9)
}
  0x19   :  { %63 = dma.hbm_to_vmem [thread:$0]  %s1312_s4, 192, %s58_s9, [#allocation9], %s1153_s27, %s1153_s27, %s1154_s28  }
  0x1a   :  { %s1072_s1 = scalar_lea.vmem %s23_s11, 64  ;;  %p1077_p11 = scmp.lt.s32.totalorder %s23_s11, %s23_s11 }
  0x1b   :  { %p1073_p10 = scmp.ne.s32.totalorder %s23_s11, %s1072_s1  ;;  %p1078_p12 = scmp.lt.s32.totalorder %s1072_s1, %s1072_s1 }
  0x1d   :  { %p1079_p13 = por %p1078_p12, %p1077_p11 }
  0x1f   :  { %p1080_p0 = pnand %p1079_p13, %p1073_p10 }
  0x21   :  { %1083 = shalt.err (!%p1080_p0)
}
  0x22   :  { %25 = dma.hbm_to_vmem [thread:$0]  %s1308_s0, 64, %s23_s11, [#allocation3]  }
  0x23   :  { %s1157_s17 = smov [#allocation7]   ;;  %s1158_s19 = smov [#allocation10]  }
  0x24   :  { %s45_s18 = sshll.u32 %s1157_s17, 4  ;;  %s69_s20 = sshll.u32 %s1158_s19, 4  ;;  %s46_s18 = int_to_ptr.vmem [resolvable:$true] %s45_s18  ;;  %s70_s20 = int_to_ptr.vmem [resolvable:$true] %s69_s20 }
  0x25   :  { %s1092_s21 = scalar_lea.vmem %s46_s18, 3072  ;;  %p1097_p2 = scmp.lt.s32.totalorder %s46_s18, %s46_s18 }
  0x26   :  { %p1093_p1 = scmp.ne.s32.totalorder %s46_s18, %s1092_s21  ;;  %p1098_p3 = scmp.lt.s32.totalorder %s1092_s21, %s1092_s21 }
  0x28   :  { %p1099_p4 = por %p1098_p3, %p1097_p2 }
  0x2a   :  { %p1100_p5 = pnand %p1099_p4, %p1093_p1 }
  0x2c   :  { %1103 = shalt.err (!%p1100_p5)
}
  0x2d   :  { %51 = dma.hbm_to_vmem [thread:$0]  %s1311_s3, 3072, %s46_s18, [#allocation6], %s1153_s27, %s1153_s27, %s1154_s28  }
  0x2e   :  { %s1112_s0 = scalar_lea.vmem %s70_s20, 1024  ;;  %p1117_p7 = scmp.lt.s32.totalorder %s70_s20, %s70_s20 }
  0x2f   :  { %p1113_p6 = scmp.ne.s32.totalorder %s70_s20, %s1112_s0  ;;  %p1118_p8 = scmp.lt.s32.totalorder %s1112_s0, %s1112_s0 }
  0x31   :  { %p1119_p9 = por %p1118_p8, %p1117_p7 }
  0x33   :  { %p1120_p10 = pnand %p1119_p9, %p1113_p6 }
  0x35   :  { %1123 = shalt.err (!%p1120_p10)
}
  0x36   :  { %75 = dma.hbm_to_vmem [thread:$0]  %s1313_s5, 1024, %s70_s20, [#allocation9], %s1153_s27, %s1153_s27, %s1154_s28  }
  0x37   :  { %1144 = dma.done.wait [#allocation3], 64  }
  0x38   :  { %1145 = vsyncadd [#allocation3], 4294967232 }
  0x39   :  { %1146 = dma.done.wait [#allocation6], 4096  }
  0x3a   :  { %1147 = vsyncadd [#allocation6], 4294963200 }
  0x3b   :  { %1148 = dma.done.wait [#allocation9], 1216  }
  0x3c   :  { %1149 = vsyncadd [#allocation9], 4294966080  ;;  %v1159_v0 = vmov 0.0   ;;  %vm1160_vm0 = vmmov 0   ;;  %v978_v1 = vld [vmem:[#allocation5 + $0x38] sm:$0xff]   ;;  %v979_v2 = vld [vmem:[#allocation5 + $0x30] sm:$0xff]   ;;  %v224_v33 = vlaneseq }
  0x3d   :  { %868 = vmatprep.subr.bf16.mxu0 %v1159_v0  ;;  %884 = vmatprep.mubr.msk.bf16.mxu0 %vm1160_vm0, %v1159_v0  ;;  %v980_v3 = vld [vmem:[#allocation5 + $0x28] sm:$0xff]   ;;  %v986_v4 = vld [vmem:[#allocation7 + $0x38] sm:$0xff]   ;;  %v981_v5 = vld [vmem:[#allocation5 + $0x20] sm:$0xff]   ;;  %s1161_s26 = smov [#allocation11]  }
  0x3e   :  { %888 = vmatprep.subr.bf16.mxu1 %v1159_v0  ;;  %904 = vmatprep.mubr.msk.bf16.mxu1 %vm1160_vm0, %v1159_v0  ;;  %v987_v6 = vld [vmem:[#allocation7 + $0x30] sm:$0xff]   ;;  %v982_v7 = vld [vmem:[#allocation5 + $0x18] sm:$0xff]   ;;  %v988_v8 = vld [vmem:[#allocation7 + $0x28] sm:$0xff]   ;;  %v225_v34 = vshrl.u32 %v224_v33, 7  ;;  %s770_s27 = sshll.u32 %s1161_s26, 4  ;;  %s771_s27 = int_to_ptr.vmem [resolvable:$true] %s770_s27 }
  0x3f   :  { %869 = vmatpush3.bf16.msra.mxu0 %v978_v1  ;;  %889 = vmatpush3.bf16.msra.mxu1 %v986_v4  ;;  %v983_v9 = vld [vmem:[#allocation5 + $0x10] sm:$0xff]   ;;  %v989_v10 = vld [vmem:[#allocation7 + $0x20] sm:$0xff]   ;;  %v984_v11 = vld [vmem:[#allocation5 + $0x8] sm:$0xff]   ;;  %s1124_s28 = scalar_lea.vmem %s771_s27, 128  ;;  %p1129_p12 = scmp.lt.s32.totalorder %s771_s27, %s771_s27 }
  0x40   :  { %870 = vmatprep.subr.bf16.mxu0 %v1159_v0  ;;  %890 = vmatprep.subr.bf16.mxu1 %v1159_v0  ;;  %v990_v12 = vld [vmem:[#allocation7 + $0x18] sm:$0xff]   ;;  %v985_v13 = vld [vmem:[#allocation5] sm:$0xff]   ;;  %v991_v14 = vld [vmem:[#allocation7 + $0x10] sm:$0xff]   ;;  %v1270_v35 = vsub.s32 0, %v225_v34  ;;  %v1273_v62 = vsub.s32 1, %v225_v34  ;;  %p1125_p11 = scmp.ne.s32.totalorder %s771_s27, %s1124_s28  ;;  %p1130_p13 = scmp.lt.s32.totalorder %s1124_s28, %s1124_s28 }
  0x41   :  { %v94_v15 = vld [vmem:[#allocation2] sm:$0xf]  ;;  %v992_v16 = vld [vmem:[#allocation7 + $0x8] sm:$0xff]   ;;  %v993_v17 = vld [vmem:[#allocation7] sm:$0xff]  }
  0x42   :  { %v781_v18 = vld [vmem:[%s1310_s2] ss:$0 sm:$0xff]  ;;  %v995_v26 = vld [vmem:[#allocation7 + $0x70] sm:$0xff]   ;;  %v996_v27 = vld [vmem:[#allocation7 + $0x68] sm:$0xff]   ;;  %p1131_p0 = por %p1130_p13, %p1129_p12 }
  0x43   :  { %871 = vmatpush3.bf16.msra.mxu0 %v979_v2  ;;  %891 = vmatpush3.bf16.msra.mxu1 %v987_v6  ;;  %v994_v25 = vld [vmem:[#allocation7 + $0x78] sm:$0xff]   ;;  %v997_v28 = vld [vmem:[#allocation7 + $0x60] sm:$0xff]   ;;  %v999_v30 = vld [vmem:[#allocation7 + $0x50] sm:$0xff]   ;;  %v1276_v6 = vsub.s32 2, %v225_v34 }
  0x44   :  { %872 = vmatprep.subr.bf16.mxu0 %v1159_v0  ;;  %892 = vmatprep.subr.bf16.mxu1 %v1159_v0  ;;  %v998_v29 = vld [vmem:[#allocation7 + $0x58] sm:$0xff]   ;;  %v1000_v31 = vld [vmem:[#allocation7 + $0x48] sm:$0xff]   ;;  %v1001_v32 = vld [vmem:[#allocation7 + $0x40] sm:$0xff]   ;;  %p1132_p1 = pnand %p1131_p0, %p1125_p11 }
  0x45   :  { %v222_v36 = vld [vmem:[#allocation8] sm:$0x7] }
  0x46   :  { %v227_v37 = vrot.slane %v222_v36, %v1270_v35 }
  0x47   :  { %873 = vmatpush3.bf16.msra.mxu0 %v980_v3  ;;  %893 = vmatpush3.bf16.msra.mxu1 %v988_v8 }
  0x48   :  { %874 = vmatprep.subr.bf16.mxu0 %v1159_v0  ;;  %894 = vmatprep.subr.bf16.mxu1 %v1159_v0 }
  0x4b   :  { %875 = vmatpush3.bf16.msra.mxu0 %v981_v5  ;;  %895 = vmatpush3.bf16.msra.mxu1 %v989_v10 }
  0x4c   :  { %876 = vmatprep.subr.bf16.mxu0 %v1159_v0  ;;  %896 = vmatprep.subr.bf16.mxu1 %v1159_v0 }
  0x4f   :  { %877 = vmatpush3.bf16.msra.mxu0 %v982_v7  ;;  %897 = vmatpush3.bf16.msra.mxu1 %v990_v12  ;;  %v1002_v12 = vld [vmem:[#allocation7 + $0xb8] sm:$0xff]  }
  0x50   :  { %878 = vmatprep.subr.bf16.mxu0 %v1159_v0  ;;  %898 = vmatprep.subr.bf16.mxu1 %v1159_v0 }
  0x53   :  { %879 = vmatpush3.bf16.msra.mxu0 %v983_v9  ;;  %899 = vmatpush3.bf16.msra.mxu1 %v991_v14  ;;  %v1004_v14 = vld [vmem:[#allocation7 + $0xa8] sm:$0xff]  }
  0x54   :  { %880 = vmatprep.subr.bf16.mxu0 %v1159_v0  ;;  %900 = vmatprep.subr.bf16.mxu1 %v1159_v0 }
  0x57   :  { %881 = vmatpush3.bf16.msra.mxu0 %v984_v11  ;;  %901 = vmatpush3.bf16.msra.mxu1 %v992_v16  ;;  %v1006_v16 = vld [vmem:[#allocation7 + $0x98] sm:$0xff]  }
  0x58   :  { %882 = vmatprep.subr.bf16.mxu0 %v1159_v0  ;;  %902 = vmatprep.subr.bf16.mxu1 %v1159_v0 }
  0x5b   :  { %883 = vmatpush3.bf16.msra.mxu0 %v985_v13  ;;  %903 = vmatpush3.bf16.msra.mxu1 %v993_v17  ;;  %v1003_v13 = vld [vmem:[#allocation7 + $0xb0] sm:$0xff]  }
  0x5c   :  { %908 = vmatprep.subr.bf16.mxu0 %v1159_v0  ;;  %928 = vmatprep.subr.bf16.mxu1 %v1159_v0  ;;  %v1007_v17 = vld [vmem:[#allocation7 + $0x90] sm:$0xff]  }
  0x5e   :  { %885 = vmatmul.mubr.bf16.vlgmr.msra.gmra.mxu0 %v94_v15  ;;  %v1005_v15 = vld [vmem:[#allocation7 + $0xa0] sm:$0xff]  }
  0x5f   :  { %924 = vmatprep.mubr.msk.bf16.mxu0 %vm1160_vm0, %v1159_v0  ;;  %909 = vmatpush3.bf16.msra.mxu0 %v994_v25 }
  0x60   :  { %910 = vmatprep.subr.bf16.mxu0 %v1159_v0 }
  0x63   :  { %911 = vmatpush3.bf16.msra.mxu0 %v995_v26 }
  0x64   :  { %912 = vmatprep.subr.bf16.mxu0 %v1159_v0 }
  0x67   :  { %913 = vmatpush3.bf16.msra.mxu0 %v996_v27 }
  0x68   :  { %914 = vmatprep.subr.bf16.mxu0 %v1159_v0 }
  0x6b   :  { %915 = vmatpush3.bf16.msra.mxu0 %v997_v28 }
  0x6c   :  { %916 = vmatprep.subr.bf16.mxu0 %v1159_v0 }
  0x6f   :  { %917 = vmatpush3.bf16.msra.mxu0 %v998_v29 }
  0x70   :  { %918 = vmatprep.subr.bf16.mxu0 %v1159_v0 }
  0x73   :  { %919 = vmatpush3.bf16.msra.mxu0 %v999_v30 }
  0x74   :  { %920 = vmatprep.subr.bf16.mxu0 %v1159_v0 }
  0x77   :  { %921 = vmatpush3.bf16.msra.mxu0 %v1000_v31 }
  0x78   :  { %922 = vmatprep.subr.bf16.mxu0 %v1159_v0 }
  0x7b   :  { %923 = vmatpush3.bf16.msra.mxu0 %v1001_v32 }
  0x7c   :  { %948 = vmatprep.subr.bf16.mxu0 %v1159_v0 }
 0x11e   :  { %v200_v19 = vpop.f32.mrf.mxu0 }
 0x11f   :  { %v1256_v20 = vadd.f32 %v781_v18, %v200_v19  ;;  %v1008_v18 = vld [vmem:[#allocation7 + $0x88] sm:$0xff]   ;;  %v1009_v19 = vld [vmem:[#allocation7 + $0x80] sm:$0xff]  }
 0x120   :  { %v886_v21 = vpop.f32.mrf.mxu0 }
 0x121   :  { %v223_v22 = vpack.c.bf16 %v1256_v20, %v1256_v20 }
 0x122   :  { %v203_v23 = vpop.f32.mrf.mxu0 }
 0x123   :  { %905 = vmatmul.mubr.bf16.vlgmr.msra.gmra.mxu1 %v223_v22 }
 0x124   :  { %v887_v24 = vpop.f32.mrf.mxu0  ;;  %944 = vmatprep.mubr.msk.bf16.mxu1 %vm1160_vm0, %v1159_v0  ;;  %929 = vmatpush3.bf16.msra.mxu1 %v1002_v12 }
 0x125   :  { %930 = vmatprep.subr.bf16.mxu1 %v1159_v0 }
 0x128   :  { %931 = vmatpush3.bf16.msra.mxu1 %v1003_v13 }
 0x129   :  { %932 = vmatprep.subr.bf16.mxu1 %v1159_v0 }
 0x12c   :  { %933 = vmatpush3.bf16.msra.mxu1 %v1004_v14 }
 0x12d   :  { %934 = vmatprep.subr.bf16.mxu1 %v1159_v0 }
 0x130   :  { %935 = vmatpush3.bf16.msra.mxu1 %v1005_v15 }
 0x131   :  { %936 = vmatprep.subr.bf16.mxu1 %v1159_v0 }
 0x134   :  { %937 = vmatpush3.bf16.msra.mxu1 %v1006_v16 }
 0x135   :  { %938 = vmatprep.subr.bf16.mxu1 %v1159_v0 }
 0x138   :  { %939 = vmatpush3.bf16.msra.mxu1 %v1007_v17 }
 0x139   :  { %940 = vmatprep.subr.bf16.mxu1 %v1159_v0 }
 0x13c   :  { %941 = vmatpush3.bf16.msra.mxu1 %v1008_v18 }
 0x13d   :  { %942 = vmatprep.subr.bf16.mxu1 %v1159_v0 }
 0x140   :  { %943 = vmatpush3.bf16.msra.mxu1 %v1009_v19 }
 0x1e3   :  { %v310_v38 = vpop.f32.mrf.mxu1 }
 0x1e4   :  { %v311_v39 = vadd.f32 %v310_v38, %v227_v37 }
 0x1e5   :  { %v906_v40 = vpop.f32.mrf.mxu1 }
 0x1e6   :  { %v316_v41 = vmax.f32 %v311_v39, 0.0 }
 0x1e7   :  { %v313_v42 = vpop.f32.mrf.mxu1 }
 0x1e8   :  { %v317_v43 = vrot.slane %v316_v41, 4  ;;  %v323_v44 = vmul.f32 %v316_v41, %v316_v41 }
 0x1e9   :  { %v907_v45 = vpop.f32.mrf.mxu1 }
 0x1ea   :  { %v318_v46 = vadd.f32 %v317_v43, %v316_v41  ;;  %v324_v47 = vrot.slane %v323_v44, 4 }
 0x1ec   :  { %v319_v48 = vrot.slane %v318_v46, 2  ;;  %v325_v49 = vadd.f32 %v324_v47, %v323_v44 }
 0x1ee   :  { %v320_v50 = vadd.f32 %v319_v48, %v318_v46  ;;  %v326_v51 = vrot.slane %v325_v49, 2 }
 0x1f0   :  { %v321_v52 = vrot.slane %v320_v50, 1  ;;  %v327_v53 = vadd.f32 %v326_v51, %v325_v49 }
 0x1f2   :  { %v322_v54 = vadd.f32 %v321_v52, %v320_v50  ;;  %v328_v55 = vrot.slane %v327_v53, 1 }
 0x1f4   :  { %v329_v56 = vadd.f32 %v328_v55, %v327_v53  ;;  %v330_v57 = vmul.f32 0.125, %v322_v54 }
 0x1f6   :  { %v331_v58 = vmul.f32 0.125, %v329_v56  ;;  %v332_v59 = vmul.f32 %v330_v57, %v330_v57 }
 0x1f8   :  { %v333_v60 = vsub.f32 %v331_v58, %v332_v59  ;;  %v1010_v58 = vld [vmem:[#allocation10 + $0x38] sm:$0xff]   ;;  %v1011_v59 = vld [vmem:[#allocation10 + $0x30] sm:$0xff]  }
 0x1fa   :  { %v334_v61 = vadd.f32 1e-05, %v333_v60  ;;  %v1012_v60 = vld [vmem:[#allocation10 + $0x28] sm:$0xff]  }
 0x1fc   :  { %1018 = vrsqrt.f32 %v334_v61  ;;  %v1013_v61 = vld [vmem:[#allocation10 + $0x20] sm:$0xff]  }
 0x209   :  { %v1019_v63 = vpop.eup %1018 }
 0x20a   :  { %v336_v1 = vmul.f32 %v1019_v63, %v222_v36  ;;  %v1014_v63 = vld [vmem:[#allocation10 + $0x18] sm:$0xff]  }
 0x20c   :  { %v337_v2 = vmul.f32 %v336_v1, %v330_v57  ;;  %v345_v3 = vrot.slane %v336_v1, %v1273_v62  ;;  %v1015_v1 = vld [vmem:[#allocation10 + $0x10] sm:$0xff]  }
 0x20e   :  { %v339_v4 = vrot.slane %v337_v2, 7  ;;  %v346_v5 = vmul.f32 %v345_v3, %v316_v41  ;;  %v1016_v2 = vld [vmem:[#allocation10 + $0x8] sm:$0xff]   ;;  %v1017_v3 = vld [vmem:[#allocation10] sm:$0xff]  }
 0x210   :  { %v341_v7 = vsub.f32 %v222_v36, %v339_v4  ;;  %v347_v8 = vadd.f32 %v346_v5, %v1256_v20  ;;  %v371_v20 = vld [vmem:[#allocation8 + $0x4] sm:$0x7]  ;;  %v520_v4 = vld [vmem:[#allocation8 + $0x8] sm:$0x7] }
 0x211   :  { %v376_v21 = vrot.slane %v371_v20, %v1270_v35  ;;  %v525_v5 = vrot.slane %v520_v4, %v1270_v35 }
 0x212   :  { %v351_v9 = vrot.slane %v341_v7, %v1276_v6 }
 0x214   :  { %v352_v10 = vadd.f32 %v351_v9, %v347_v8 }
 0x216   :  { %v372_v11 = vpack.c.bf16 %v352_v10, %v352_v10 }
 0x218   :  { %925 = vmatmul.mubr.bf16.vlgmr.msra.gmra.mxu0 %v372_v11 }
 0x219   :  { %964 = vmatprep.mubr.msk.bf16.mxu0 %vm1160_vm0, %v1159_v0  ;;  %949 = vmatpush3.bf16.msra.mxu0 %v1010_v58 }
 0x21a   :  { %950 = vmatprep.subr.bf16.mxu0 %v1159_v0 }
 0x21d   :  { %951 = vmatpush3.bf16.msra.mxu0 %v1011_v59 }
 0x21e   :  { %952 = vmatprep.subr.bf16.mxu0 %v1159_v0 }
 0x221   :  { %953 = vmatpush3.bf16.msra.mxu0 %v1012_v60 }
 0x222   :  { %954 = vmatprep.subr.bf16.mxu0 %v1159_v0 }
 0x225   :  { %955 = vmatpush3.bf16.msra.mxu0 %v1013_v61 }
 0x226   :  { %956 = vmatprep.subr.bf16.mxu0 %v1159_v0 }
 0x229   :  { %957 = vmatpush3.bf16.msra.mxu0 %v1014_v63 }
 0x22a   :  { %958 = vmatprep.subr.bf16.mxu0 %v1159_v0 }
 0x22d   :  { %959 = vmatpush3.bf16.msra.mxu0 %v1015_v1 }
 0x22e   :  { %960 = vmatprep.subr.bf16.mxu0 %v1159_v0 }
 0x231   :  { %961 = vmatpush3.bf16.msra.mxu0 %v1016_v2 }
 0x232   :  { %962 = vmatprep.subr.bf16.mxu0 %v1159_v0 }
 0x235   :  { %963 = vmatpush3.bf16.msra.mxu0 %v1017_v3 }
 0x2d8   :  { %v459_v22 = vpop.f32.mrf.mxu0 }
 0x2d9   :  { %v460_v23 = vadd.f32 %v459_v22, %v376_v21 }
 0x2da   :  { %v926_v24 = vpop.f32.mrf.mxu0 }
 0x2db   :  { %v465_v25 = vmax.f32 %v460_v23, 0.0 }
 0x2dc   :  { %v462_v26 = vpop.f32.mrf.mxu0 }
 0x2dd   :  { %v466_v27 = vrot.slane %v465_v25, 4  ;;  %v472_v28 = vmul.f32 %v465_v25, %v465_v25 }
 0x2de   :  { %v927_v29 = vpop.f32.mrf.mxu0 }
 0x2df   :  { %v467_v30 = vadd.f32 %v466_v27, %v465_v25  ;;  %v473_v31 = vrot.slane %v472_v28, 4 }
 0x2e1   :  { %v468_v32 = vrot.slane %v467_v30, 2  ;;  %v474_v33 = vadd.f32 %v473_v31, %v472_v28 }
 0x2e3   :  { %v469_v34 = vadd.f32 %v468_v32, %v467_v30  ;;  %v475_v36 = vrot.slane %v474_v33, 2 }
 0x2e5   :  { %v470_v37 = vrot.slane %v469_v34, 1  ;;  %v476_v38 = vadd.f32 %v475_v36, %v474_v33 }
 0x2e7   :  { %v471_v39 = vadd.f32 %v470_v37, %v469_v34  ;;  %v477_v40 = vrot.slane %v476_v38, 1 }
 0x2e9   :  { %v478_v41 = vadd.f32 %v477_v40, %v476_v38  ;;  %v479_v42 = vmul.f32 0.125, %v471_v39 }
 0x2eb   :  { %v480_v43 = vmul.f32 0.125, %v478_v41  ;;  %v481_v44 = vmul.f32 %v479_v42, %v479_v42  ;;  %v814_v41 = vld [vmem:[%s1314_s6] ss:$0 sm:$0xff] }
 0x2ed   :  { %v482_v45 = vsub.f32 %v480_v43, %v481_v44 }
 0x2ef   :  { %v483_v46 = vadd.f32 1e-05, %v482_v45 }
 0x2f1   :  { %1020 = vrsqrt.f32 %v483_v46 }
 0x2fe   :  { %v1021_v47 = vpop.eup %1020 }
 0x2ff   :  { %v485_v48 = vmul.f32 %v1021_v47, %v371_v20 }
 0x301   :  { %v486_v49 = vmul.f32 %v485_v48, %v479_v42  ;;  %v494_v50 = vrot.slane %v485_v48, %v1273_v62 }
 0x303   :  { %v488_v51 = vrot.slane %v486_v49, 7  ;;  %v495_v52 = vmul.f32 %v494_v50, %v465_v25 }
 0x305   :  { %v490_v53 = vsub.f32 %v371_v20, %v488_v51  ;;  %v496_v54 = vadd.f32 %v495_v52, %v352_v10 }
 0x307   :  { %v500_v55 = vrot.slane %v490_v53, %v1276_v6 }
 0x309   :  { %v501_v56 = vadd.f32 %v500_v55, %v496_v54 }
 0x30b   :  { %v521_v57 = vpack.c.bf16 %v501_v56, %v501_v56 }
 0x30d   :  { %945 = vmatmul.mubr.bf16.vlgmr.msra.gmra.mxu1 %v521_v57 }
 0x3cd   :  { %v608_v7 = vpop.f32.mrf.mxu1 }
 0x3ce   :  { %v609_v8 = vadd.f32 %v608_v7, %v525_v5 }
 0x3cf   :  { %v946_v9 = vpop.f32.mrf.mxu1 }
 0x3d0   :  { %v614_v10 = vmax.f32 %v609_v8, 0.0 }
 0x3d1   :  { %v611_v11 = vpop.f32.mrf.mxu1 }
 0x3d2   :  { %v615_v12 = vrot.slane %v614_v10, 4  ;;  %v621_v13 = vmul.f32 %v614_v10, %v614_v10 }
 0x3d3   :  { %v947_v14 = vpop.f32.mrf.mxu1 }
 0x3d4   :  { %v616_v15 = vadd.f32 %v615_v12, %v614_v10  ;;  %v622_v16 = vrot.slane %v621_v13, 4 }
 0x3d6   :  { %v617_v17 = vrot.slane %v616_v15, 2  ;;  %v623_v18 = vadd.f32 %v622_v16, %v621_v13 }
 0x3d8   :  { %v618_v19 = vadd.f32 %v617_v17, %v616_v15  ;;  %v624_v20 = vrot.slane %v623_v18, 2 }
 0x3da   :  { %v619_v0 = vrot.slane %v618_v19, 1  ;;  %v625_v21 = vadd.f32 %v624_v20, %v623_v18 }
 0x3dc   :  { %v620_v22 = vadd.f32 %v619_v0, %v618_v19  ;;  %v626_v23 = vrot.slane %v625_v21, 1 }
 0x3de   :  { %v627_v24 = vadd.f32 %v626_v23, %v625_v21  ;;  %v628_v35 = vmul.f32 0.125, %v620_v22 }
 0x3e0   :  { %v629_v25 = vmul.f32 0.125, %v627_v24  ;;  %v630_v26 = vmul.f32 %v628_v35, %v628_v35 }
 0x3e2   :  { %v631_v27 = vsub.f32 %v629_v25, %v630_v26 }
 0x3e4   :  { %v632_v28 = vadd.f32 1e-05, %v631_v27 }
 0x3e6   :  { %1022 = vrsqrt.f32 %v632_v28 }
 0x3f3   :  { %v1023_v29 = vpop.eup %1022 }
 0x3f4   :  { %v634_v30 = vmul.f32 %v1023_v29, %v520_v4 }
 0x3f6   :  { %v635_v31 = vmul.f32 %v634_v30, %v628_v35  ;;  %v643_v32 = vrot.slane %v634_v30, %v1273_v62 }
 0x3f8   :  { %v637_v33 = vrot.slane %v635_v31, 7  ;;  %v644_v34 = vmul.f32 %v643_v32, %v614_v10 }
 0x3fa   :  { %v639_v36 = vsub.f32 %v520_v4, %v637_v33  ;;  %v645_v38 = vadd.f32 %v644_v34, %v501_v56 }
 0x3fc   :  { %v649_v37 = vrot.slane %v639_v36, %v1276_v6 }
 0x3fe   :  { %v650_v39 = vadd.f32 %v649_v37, %v645_v38 }
 0x400   :  { %v651_v40 = vpack.c.bf16 %v650_v39, %v650_v39 }
 0x402   :  { %965 = vmatmul.mubr.bf16.vlgmr.msra.gmra.mxu0 %v651_v40 }
 0x4c2   :  { %v757_v42 = vpop.f32.mrf.mxu0 }
 0x4c3   :  { %v758_v43 = vadd.f32 %v814_v41, %v757_v42 }
 0x4c4   :  { %v966_v44 = vpop.f32.mrf.mxu0 }
 0x4c5   :  { %763 = vst [vmem:[#allocation11] sm:$0xff] %v758_v43 }
 0x4c6   :  { %v760_v62 = vpop.f32.mrf.mxu0 }
 0x4c7   :  { %1135 = shalt.err (!%p1132_p1)
}
 0x4c8   :  { %773 = dma.vmem_to_hbm [thread:$0]  %s771_s27, 128, %s1315_s7, [#allocation4]   ;;  %v967_v6 = vpop.f32.mrf.mxu0 }
 0x4c9   :  { %1150 = dma.done.wait [#allocation4], 128  }
 0x4ca   :  { %1151 = vsyncadd [#allocation4], 4294967168 }
 0x4cb   :  { %777 = vsyncpa [#allocation3], 1 }
 0x4cc   :  { %778 = vsyncpa [#allocation6], 1 }
 0x4cd   :  { %779 = vsyncpa [#allocation9], 1 }
 0x4ce   :  { %780 = vsyncpa [#allocation4], 1 }

</bundles_post_ra>
